<compile_context>
chip_gen: v7x
topology: tpu7x:2x2x1
jax: 0.10.0
libtpu: 0.0.40
codegen_flags: <defaults>
</compile_context>

<pallas_src>
import functools

import jax
import jax.numpy as jnp
from jax.experimental import pallas as pl
from jax.experimental.pallas import tpu as pltpu


def _contrastive_kernel(img_ref, pose_ref,
                        wiq_ref, wiscale_ref, bi_ref,
                        w1_ref, b1_ref,
                        w2_ref, b2_ref,
                        zimg_ref, zpose_ref):
    # ---- Image branch: Flatten (done via metadata reshape in wrapper) ->
    #      Linear(C*H*W, E) with int8 weight, per-output-channel dequant on
    #      the f32 accumulator.
    wi_f32 = wiq_ref[...].astype(jnp.float32)               # int8 -> f32 (VPU)
    acc = jnp.dot(img_ref[...], wi_f32,
                  preferred_element_type=jnp.float32)        # (B, E) f32
    zimg_ref[...] = (acc * wiscale_ref[...] + bi_ref[...]).astype(zimg_ref.dtype)

    # ---- Pose branch: Linear(pose_dim, 64) -> ReLU -> Linear(64, E), f32.
    h = jnp.dot(pose_ref[...], w1_ref[...],
                preferred_element_type=jnp.float32) + b1_ref[...]
    h = jnp.maximum(h, 0.0)
    z_pose = jnp.dot(h, w2_ref[...],
                     preferred_element_type=jnp.float32) + b2_ref[...]
    zpose_ref[...] = z_pose.astype(zpose_ref.dtype)


@functools.partial(jax.jit, static_argnames=("embedding_dim",))
def contrastive_forward(image_feat, pose, params, embedding_dim=128):
    """image_feat: (B, C, H, W) f32, pose: (B, pose_dim) f32.

    Returns (z_img, z_pose), each (B, embedding_dim) f32, matching
    ContrastiveModel.forward (image branch uses the int8-quantized weight).
    """
    B, C, H, W = image_feat.shape
    K_img = C * H * W
    pose_dim = pose.shape[1]
    hidden = params["w1"].shape[1]  # 64 in the reference module

    # Contiguous NCHW row-major flatten == nn.Flatten; metadata-only, no copy,
    # no dtype cast (kernel consumes f32 activations directly).
    x_img = image_feat.reshape(B, K_img)

    vmem = pl.BlockSpec(memory_space=pltpu.MemorySpace.VMEM)

    flops = 2 * B * (K_img * embedding_dim
                     + pose_dim * hidden
                     + hidden * embedding_dim)
    bytes_accessed = (
        x_img.size * 4                                   # f32 image activations
        + params["wi_q"].size * 1                        # int8 image weight (dominant)
        + params["wi_scale"].size * 4 + params["bi"].size * 4
        + pose.size * 4
        + (params["w1"].size + params["b1"].size
           + params["w2"].size + params["b2"].size) * 4
        + 2 * B * embedding_dim * 4                      # outputs
    )

    z_img, z_pose = pl.pallas_call(
        _contrastive_kernel,
        out_shape=(
            jax.ShapeDtypeStruct((B, embedding_dim), jnp.float32),
            jax.ShapeDtypeStruct((B, embedding_dim), jnp.float32),
        ),
        in_specs=[vmem] * 9,
        out_specs=(vmem, vmem),
        compiler_params=pltpu.CompilerParams(vmem_limit_bytes=16 << 20),
        cost_estimate=pl.CostEstimate(flops=flops, transcendentals=0,
                                      bytes_accessed=bytes_accessed),
    )(x_img, pose,
      params["wi_q"], params["wi_scale"], params["bi"],
      params["w1"], params["b1"], params["w2"], params["b2"])

    return z_img, z_pose


def init_params(key, vae_feature_shape=(64, 8, 8), pose_input_dim=7, embedding_dim=128):
    """Weights stored in (in, out) layout (== nn.Linear.weight.T), transposed
    ONCE here (or once at PyTorch-checkpoint load time).

    The image-branch weight is symmetrically quantized to int8 with a
    per-output-channel f32 scale (z = (x @ wi_q) * scale + bias).  Biases are
    stored as (1, N) row vectors."""
    C, H, W = vae_feature_shape
    k = jax.random.split(key, 6)

    wi = jax.random.normal(k[0], (C * H * W, embedding_dim), jnp.float32) * 0.02
    amax = jnp.maximum(jnp.max(jnp.abs(wi), axis=0, keepdims=True), 1e-8)  # (1, E)
    wi_scale = amax / 127.0
    wi_q = jnp.clip(jnp.round(wi / wi_scale), -127, 127).astype(jnp.int8)  # (K, E) int8

    return {
        "wi_q": wi_q,                                                        # (K_img, E) int8
        "wi_scale": wi_scale,                                                # (1, E) f32
        "bi": (jax.random.normal(k[1], (embedding_dim,), jnp.float32) * 0.02).reshape(1, -1),
        "w1": jax.random.normal(k[2], (pose_input_dim, 64), jnp.float32) * 0.1,
        "b1": (jax.random.normal(k[3], (64,), jnp.float32) * 0.1).reshape(1, -1),
        "w2": jax.random.normal(k[4], (64, embedding_dim), jnp.float32) * 0.1,
        "b2": (jax.random.normal(k[5], (embedding_dim,), jnp.float32) * 0.1).reshape(1, -1),
    }


def reference_forward(image_feat, pose, params):
    """Pure-JAX reference of ContrastiveModel.forward using the same
    (dequantized) int8 image weight the kernel consumes — isolates kernel
    numerics from the (intentional, ~1%) quantization error."""
    B = image_feat.shape[0]
    x = image_feat.reshape(B, -1)
    wi = params["wi_q"].astype(jnp.float32) * params["wi_scale"]
    z_img = x @ wi + params["bi"]
    h = jnp.maximum(pose @ params["w1"] + params["b1"], 0.0)
    z_pose = h @ params["w2"] + params["b2"]
    return z_img, z_pose


if __name__ == "__main__":
    key = jax.random.PRNGKey(0)
    kp, ki, kq = jax.random.split(key, 3)

    B = 2
    vae_feature_shape = (64, 8, 8)     # (C, H, W) module defaults
    pose_input_dim = 7
    embedding_dim = 128

    params = init_params(kp, vae_feature_shape, pose_input_dim, embedding_dim)
    image_feat = jax.random.normal(ki, (B,) + vae_feature_shape, jnp.float32)
    pose = jax.random.normal(kq, (B, pose_input_dim), jnp.float32)

    z_img, z_pose = contrastive_forward(image_feat, pose, params,
                                        embedding_dim=embedding_dim)
    jax.block_until_ready((z_img, z_pose))

    z_img_ref, z_pose_ref = reference_forward(image_feat, pose, params)
    assert z_img.shape == (B, embedding_dim) and z_pose.shape == (B, embedding_dim)
    # Image branch: same dequantized-int8 math in kernel and reference; only
    # MXU-vs-XLA f32 matmul precision differs.
    assert jnp.allclose(z_img, z_img_ref, atol=2e-2, rtol=2e-2)
    # Pose branch is full f32 in both.
    assert jnp.allclose(z_pose, z_pose_ref, atol=1e-2, rtol=1e-2)

    print("KERNEL_OK")
</pallas_src>

<mosaic_0001>
module attributes {stable_mosaic.version = 11 : i64} {
  func.func @_contrastive_kernel(%arg0: memref<2x4096xf32, #tpu.memory_space<vmem>>, %arg1: memref<2x7xf32, #tpu.memory_space<vmem>>, %arg2: memref<4096x128xi8, #tpu.memory_space<vmem>>, %arg3: memref<1x128xf32, #tpu.memory_space<vmem>>, %arg4: memref<1x128xf32, #tpu.memory_space<vmem>>, %arg5: memref<7x64xf32, #tpu.memory_space<vmem>>, %arg6: memref<1x64xf32, #tpu.memory_space<vmem>>, %arg7: memref<64x128xf32, #tpu.memory_space<vmem>>, %arg8: memref<1x128xf32, #tpu.memory_space<vmem>>, %arg9: memref<2x128xf32, #tpu.memory_space<vmem>>, %arg10: memref<2x128xf32, #tpu.memory_space<vmem>>) attributes {dimension_semantics = [], scalar_prefetch = 0 : i64, scratch_operands = 0 : i64, tpu.core_type = #tpu.core_type<tc>} {
    %c0 = arith.constant 0 : index
    %c0_0 = arith.constant 0 : index
    %0 = vector.load %arg2[%c0, %c0_0] : memref<4096x128xi8, #tpu.memory_space<vmem>>, vector<4096x128xi8>
    %1 = arith.sitofp %0 : vector<4096x128xi8> to vector<4096x128xf32>
    %c0_1 = arith.constant 0 : index
    %c0_2 = arith.constant 0 : index
    %2 = vector.load %arg0[%c0_1, %c0_2] : memref<2x4096xf32, #tpu.memory_space<vmem>>, vector<2x4096xf32>
    %cst = arith.constant dense<0.000000e+00> : vector<2x128xf32>
    %3 = tpu.matmul %2, %1, %cst {dimension_numbers = #tpu.dot_dimension_numbers<[1], [0], [0], [1], [0, 0, 1, 1], [], []>} : vector<2x4096xf32>, vector<4096x128xf32>, vector<2x128xf32> -> vector<2x128xf32>
    %c0_3 = arith.constant 0 : index
    %c0_4 = arith.constant 0 : index
    %4 = vector.load %arg3[%c0_3, %c0_4] : memref<1x128xf32, #tpu.memory_space<vmem>>, vector<1x128xf32>
    %5 = vector.broadcast %4 : vector<1x128xf32> to vector<2x128xf32>
    %6 = arith.mulf %3, %5 : vector<2x128xf32>
    %c0_5 = arith.constant 0 : index
    %c0_6 = arith.constant 0 : index
    %7 = vector.load %arg4[%c0_5, %c0_6] : memref<1x128xf32, #tpu.memory_space<vmem>>, vector<1x128xf32>
    %8 = vector.broadcast %7 : vector<1x128xf32> to vector<2x128xf32>
    %9 = arith.addf %6, %8 : vector<2x128xf32>
    %c0_7 = arith.constant 0 : index
    %c0_8 = arith.constant 0 : index
    %10 = vector.load %arg9[%c0_7, %c0_8] : memref<2x128xf32, #tpu.memory_space<vmem>>, vector<2x128xf32>
    tpu.vector_store %arg9[%c0_7, %c0_8], %9 {strides = array<i32>} : memref<2x128xf32, #tpu.memory_space<vmem>>, vector<2x128xf32>,
    %c0_9 = arith.constant 0 : index
    %c0_10 = arith.constant 0 : index
    %11 = vector.load %arg1[%c0_9, %c0_10] : memref<2x7xf32, #tpu.memory_space<vmem>>, vector<2x7xf32>
    %c0_11 = arith.constant 0 : index
    %c0_12 = arith.constant 0 : index
    %12 = vector.load %arg5[%c0_11, %c0_12] : memref<7x64xf32, #tpu.memory_space<vmem>>, vector<7x64xf32>
    %cst_13 = arith.constant dense<0.000000e+00> : vector<2x64xf32>
    %13 = tpu.matmul %11, %12, %cst_13 {dimension_numbers = #tpu.dot_dimension_numbers<[1], [0], [0], [1], [0, 0, 1, 1], [], []>} : vector<2x7xf32>, vector<7x64xf32>, vector<2x64xf32> -> vector<2x64xf32>
    %c0_14 = arith.constant 0 : index
    %c0_15 = arith.constant 0 : index
    %14 = vector.load %arg6[%c0_14, %c0_15] : memref<1x64xf32, #tpu.memory_space<vmem>>, vector<1x64xf32>
    %15 = vector.broadcast %14 : vector<1x64xf32> to vector<2x64xf32>
    %16 = arith.addf %13, %15 : vector<2x64xf32>
    %cst_16 = arith.constant 0.000000e+00 : f32
    %17 = vector.broadcast %cst_16 : f32 to vector<2x64xf32>
    %18 = arith.maximumf %16, %17 : vector<2x64xf32>
    %c0_17 = arith.constant 0 : index
    %c0_18 = arith.constant 0 : index
    %19 = vector.load %arg7[%c0_17, %c0_18] : memref<64x128xf32, #tpu.memory_space<vmem>>, vector<64x128xf32>
    %cst_19 = arith.constant dense<0.000000e+00> : vector<2x128xf32>
    %20 = tpu.matmul %18, %19, %cst_19 {dimension_numbers = #tpu.dot_dimension_numbers<[1], [0], [0], [1], [0, 0, 1, 1], [], []>} : vector<2x64xf32>, vector<64x128xf32>, vector<2x128xf32> -> vector<2x128xf32>
    %c0_20 = arith.constant 0 : index
    %c0_21 = arith.constant 0 : index
    %21 = vector.load %arg8[%c0_20, %c0_21] : memref<1x128xf32, #tpu.memory_space<vmem>>, vector<1x128xf32>
    %22 = vector.broadcast %21 : vector<1x128xf32> to vector<2x128xf32>
    %23 = arith.addf %20, %22 : vector<2x128xf32>
    %c0_22 = arith.constant 0 : index
    %c0_23 = arith.constant 0 : index
    %24 = vector.load %arg10[%c0_22, %c0_23] : memref<2x128xf32, #tpu.memory_space<vmem>>, vector<2x128xf32>
    tpu.vector_store %arg10[%c0_22, %c0_23], %23 {strides = array<i32>} : memref<2x128xf32, #tpu.memory_space<vmem>>, vector<2x128xf32>,
    return
  }
}

</mosaic_0001>

<bundles_post_ra>
// kernel: contrastive_forward.1
= control target key start
LH: loop header
LB: loop body
LE: loop exit
PB: predicated region body
PF: predicated region fallthrough
CT: control target
= control target key end

     0   :  { %16 = vsyncpa [#allocation3], 0  ;;  %v1208_v18 = vlaneseq  ;;  %v3903_v24 = vmov 1983009808   ;;  %s4531_s0 = inlined_call_operand.vmem [shape: f32[2,4096], index: 0, kind: input, shape index: {}]   ;;  %s4532_s1 = inlined_call_operand.vmem [shape: f32[2,7], index: 1, kind: input, shape index: {}]   ;;  %s4533_s2 = inlined_call_operand.vmem [shape: s8[4096,128], index: 2, kind: input, shape index: {}]   ;;  %s4534_s3 = inlined_call_operand.vmem [shape: f32[1,128], index: 3, kind: input, shape index: {}]   ;;  %s4535_s4 = inlined_call_operand.vmem [shape: f32[1,128], index: 4, kind: input, shape index: {}]   ;;  %s4536_s5 = inlined_call_operand.vmem [shape: f32[7,64], index: 5, kind: input, shape index: {}]   ;;  %s4537_s6 = inlined_call_operand.vmem [shape: f32[1,64], index: 6, kind: input, shape index: {}]   ;;  %s4538_s7 = inlined_call_operand.vmem [shape: f32[64,128], index: 7, kind: input, shape index: {}]   ;;  %s4539_s8 = inlined_call_operand.vmem [shape: f32[1,128], index: 8, kind: input, shape index: {}]   ;;  %s4540_s9 = inlined_call_operand.hbm [shape: f32[2,128], index: 9, kind: output, shape index: {0}]   ;;  %s4541_s10 = inlined_call_operand.hbm [shape: f32[2,128], index: 10, kind: output, shape index: {1}]  }
   0x1   :  { %v40_v0 = vld [vmem:[%s4533_s2 + $0x20] sm:$0xff]  ;;  %v41_v10 = vld [vmem:[%s4533_s2 + $0x28] sm:$0xff]  ;;  %v1206_v25 = vunpack.c.l.s4 %v3903_v24  ;;  %v42_v27 = vld [vmem:[%s4533_s2 + $0x30] sm:$0xff] }
   0x2   :  { %v48_v1 = vld [vmem:[%s4533_s2 + $0x60] sm:$0xff]  ;;  %v3317_v3 = vunpack.c.l.s8.bf16 %v40_v0  ;;  %v3321_v4 = vunpack.c.h.s8.bf16 %v40_v0  ;;  %v49_v11 = vld [vmem:[%s4533_s2 + $0x68] sm:$0xff]  ;;  %v3325_v14 = vunpack.c.l.s8.bf16 %v41_v10  ;;  %v3329_v22 = vunpack.c.h.s8.bf16 %v41_v10  ;;  %v50_v28 = vld [vmem:[%s4533_s2 + $0x70] sm:$0xff] }
   0x3   :  { %v36_v2 = vld [vmem:[%s4533_s2] sm:$0xff]  ;;  %v3349_v5 = vunpack.c.l.s8.bf16 %v48_v1  ;;  %v3353_v6 = vunpack.c.h.s8.bf16 %v48_v1  ;;  %v3357_v15 = vunpack.c.l.s8.bf16 %v49_v11  ;;  %v37_v16 = vld [vmem:[%s4533_s2 + $0x8] sm:$0xff]  ;;  %v3361_v23 = vunpack.c.h.s8.bf16 %v49_v11  ;;  %v38_v35 = vld [vmem:[%s4533_s2 + $0x10] sm:$0xff] }
   0x4   :  { %v44_v7 = vld [vmem:[%s4533_s2 + $0x40] sm:$0xff]  ;;  %v3319_v8 = vunpack.c.l.s8.bf16 %v36_v2  ;;  %3318 = vmatprep.subr.bf16.mxu0 %v3317_v3  ;;  %v3323_v12 = vunpack.c.h.s8.bf16 %v36_v2  ;;  %v45_v17 = vld [vmem:[%s4533_s2 + $0x48] sm:$0xff]  ;;  %v3327_v19 = vunpack.c.l.s8.bf16 %v37_v16  ;;  %v1209_v26 = vshrl.u32 %v1208_v18, 7  ;;  %v46_v36 = vld [vmem:[%s4533_s2 + $0x50] sm:$0xff] }
   0x5   :  { %v3351_v9 = vunpack.c.l.s8.bf16 %v44_v7  ;;  %3350 = vmatprep.subr.bf16.mxu1 %v3349_v5  ;;  %v3355_v13 = vunpack.c.h.s8.bf16 %v44_v7  ;;  %v3359_v20 = vunpack.c.l.s8.bf16 %v45_v17  ;;  %v1188_v21 = vld [vmem:[%s4531_s0] sm:$0xff]  ;;  %v1207_v29 = vunpack.c.0.s8 %v1206_v25  ;;  %v43_v46 = vld [vmem:[%s4533_s2 + $0x38] sm:$0xff]  ;;  %v1189_v54 = vld [vmem:[%s4531_s0 + $0x8] sm:$0xff] }
   0x6   :  { %3320 = vmatpush3.bf16.msra.mxu0 %v3319_v8  ;;  %v1204_v30 = vcombine.high %v1188_v21, %v1188_v21  ;;  %v3331_v31 = vunpack.c.h.s8.bf16 %v37_v16  ;;  %v3363_v32 = vunpack.c.h.s8.bf16 %v45_v17  ;;  %v3333_v33 = vunpack.c.l.s8.bf16 %v42_v27  ;;  %v51_v47 = vld [vmem:[%s4533_s2 + $0x78] sm:$0xff]  ;;  %v56_v59 = vld [vmem:[%s4533_s2 + $0xa0] sm:$0xff] }
   0x7   :  { %3352 = vmatpush3.bf16.msra.mxu1 %v3351_v9  ;;  %3322 = vmatprep.subr.bf16.mxu0 %v3321_v4  ;;  %v3365_v34 = vunpack.c.l.s8.bf16 %v50_v28  ;;  %v4003_v37 = vsub.s32 %v1207_v29, %v1209_v26  ;;  %v3335_v40 = vunpack.c.l.s8.bf16 %v38_v35  ;;  %v3367_v41 = vunpack.c.l.s8.bf16 %v46_v36  ;;  %v39_v52 = vld [vmem:[%s4533_s2 + $0x18] sm:$0xff]  ;;  %v64_v60 = vld [vmem:[%s4533_s2 + $0xe0] sm:$0xff] }
   0x8   :  { %3354 = vmatprep.subr.bf16.mxu1 %v3353_v6  ;;  %v3337_v42 = vunpack.c.h.s8.bf16 %v42_v27  ;;  %v3369_v43 = vunpack.c.h.s8.bf16 %v50_v28  ;;  %v3339_v48 = vunpack.c.h.s8.bf16 %v38_v35  ;;  %v3371_v49 = vunpack.c.h.s8.bf16 %v46_v36  ;;  %v47_v53 = vld [vmem:[%s4533_s2 + $0x58] sm:$0xff] }
   0x9   :  { %v4006_v38 = vrot.slane %v1188_v21, %v4003_v37  ;;  %v1218_v39 = vrot.slane %v1204_v30, %v4003_v37  ;;  %v3341_v50 = vunpack.c.l.s8.bf16 %v43_v46  ;;  %v3373_v51 = vunpack.c.l.s8.bf16 %v51_v47 }
   0xa   :  { %3324 = vmatpush3.bf16.msra.mxu0 %v3323_v12  ;;  %v3343_v55 = vunpack.c.l.s8.bf16 %v39_v52  ;;  %v3375_v56 = vunpack.c.l.s8.bf16 %v47_v53  ;;  %v3345_v57 = vunpack.c.h.s8.bf16 %v43_v46  ;;  %v3377_v58 = vunpack.c.h.s8.bf16 %v51_v47 }
   0xb   :  { %3356 = vmatpush3.bf16.msra.mxu1 %v3355_v13  ;;  %3326 = vmatprep.subr.bf16.mxu0 %v3325_v14  ;;  %v1219_v44 = vcombine.high %v4006_v38, %v4006_v38  ;;  %v1220_v45 = vcombine.high %v1218_v39, %v1218_v39  ;;  %v1221_v61 = vcombine.high %v1189_v54, %v1189_v54  ;;  %v3347_v62 = vunpack.c.h.s8.bf16 %v39_v52 }
   0xc   :  { %3358 = vmatprep.subr.bf16.mxu1 %v3357_v15  ;;  %v3379_v63 = vunpack.c.h.s8.bf16 %v47_v53 }
   0xd   :  { %1436 = vmatprep.mubr.f32.mxu0 %v1219_v44  ;;  %1506 = vmatprep.mubr.f32.mxu1 %v1220_v45 }
   0xe   :  { %3328 = vmatpush3.bf16.msra.mxu0 %v3327_v19 }
   0xf   :  { %3360 = vmatpush3.bf16.msra.mxu1 %v3359_v20  ;;  %3330 = vmatprep.subr.bf16.mxu0 %v3329_v22 }
  0x10   :  { %3362 = vmatprep.subr.bf16.mxu1 %v3361_v23 }
  0x12   :  { %3332 = vmatpush3.bf16.msra.mxu0 %v3331_v31 }
  0x13   :  { %3364 = vmatpush3.bf16.msra.mxu1 %v3363_v32  ;;  %3334 = vmatprep.subr.bf16.mxu0 %v3333_v33 }
  0x14   :  { %3366 = vmatprep.subr.bf16.mxu1 %v3365_v34 }
  0x16   :  { %3336 = vmatpush3.bf16.msra.mxu0 %v3335_v40 }
  0x17   :  { %3368 = vmatpush3.bf16.msra.mxu1 %v3367_v41  ;;  %3338 = vmatprep.subr.bf16.mxu0 %v3337_v42 }
  0x18   :  { %3370 = vmatprep.subr.bf16.mxu1 %v3369_v43 }
  0x1a   :  { %3340 = vmatpush3.bf16.msra.mxu0 %v3339_v48 }
  0x1b   :  { %3372 = vmatpush3.bf16.msra.mxu1 %v3371_v49  ;;  %3342 = vmatprep.subr.bf16.mxu0 %v3341_v50 }
  0x1c   :  { %3374 = vmatprep.subr.bf16.mxu1 %v3373_v51 }
  0x1e   :  { %3344 = vmatpush3.bf16.msra.mxu0 %v3343_v55 }
  0x1f   :  { %3376 = vmatpush3.bf16.msra.mxu1 %v3375_v56 }
  0x20   :  { %17 = vsyncpa [#allocation5], 0  ;;  %3346 = vmatprep.subr.bf16.mxu0 %v3345_v57  ;;  %3378 = vmatprep.subr.bf16.mxu1 %v3377_v58  ;;  %v3381_v0 = vunpack.c.l.s8.bf16 %v56_v59  ;;  %v52_v1 = vld [vmem:[%s4533_s2 + $0x80] sm:$0xff]  ;;  %v3413_v2 = vunpack.c.l.s8.bf16 %v64_v60  ;;  %v4039_v4 = vrot.slane %v1189_v54, %v4003_v37  ;;  %v4042_v5 = vrot.slane %v1221_v61, %v4003_v37  ;;  %v57_v10 = vld [vmem:[%s4533_s2 + $0xa8] sm:$0xff] }
  0x21   :  { %v60_v3 = vld [vmem:[%s4533_s2 + $0xc0] sm:$0xff]  ;;  %v3383_v6 = vunpack.c.l.s8.bf16 %v52_v1  ;;  %v3385_v8 = vunpack.c.h.s8.bf16 %v56_v59  ;;  %v3417_v9 = vunpack.c.h.s8.bf16 %v64_v60  ;;  %v65_v11 = vld [vmem:[%s4533_s2 + $0xe8] sm:$0xff]  ;;  %v3387_v14 = vunpack.c.h.s8.bf16 %v52_v1  ;;  %v58_v24 = vld [vmem:[%s4533_s2 + $0xb0] sm:$0xff] }
  0x22   :  { %3348 = vmatpush3.bf16.msra.mxu0 %v3347_v62  ;;  %v3415_v7 = vunpack.c.l.s8.bf16 %v60_v3  ;;  %v1236_v12 = vcombine.high %v4039_v4, %v4039_v4  ;;  %v1237_v13 = vcombine.high %v4042_v5, %v4042_v5  ;;  %v3419_v15 = vunpack.c.h.s8.bf16 %v60_v3  ;;  %v53_v17 = vld [vmem:[%s4533_s2 + $0x88] sm:$0xff]  ;;  %v66_v25 = vld [vmem:[%s4533_s2 + $0xf0] sm:$0xff]  ;;  %v59_v36 = vld [vmem:[%s4533_s2 + $0xb8] sm:$0xff] }
  0x23   :  { %3380 = vmatpush3.bf16.msra.mxu1 %v3379_v63  ;;  %3382 = vmatprep.subr.bf16.mxu0 %v3381_v0  ;;  %v3389_v16 = vunpack.c.l.s8.bf16 %v57_v10  ;;  %v3421_v18 = vunpack.c.l.s8.bf16 %v65_v11  ;;  %v61_v19 = vld [vmem:[%s4533_s2 + $0xc8] sm:$0xff]  ;;  %v3391_v20 = vunpack.c.l.s8.bf16 %v53_v17  ;;  %v3393_v22 = vunpack.c.h.s8.bf16 %v57_v10  ;;  %v54_v29 = vld [vmem:[%s4533_s2 + $0x90] sm:$0xff]  ;;  %v55_v42 = vld [vmem:[%s4533_s2 + $0x98] sm:$0xff] }
  0x24   :  { %3414 = vmatprep.subr.bf16.mxu1 %v3413_v2  ;;  %v3423_v21 = vunpack.c.l.s8.bf16 %v61_v19  ;;  %v3425_v23 = vunpack.c.h.s8.bf16 %v65_v11  ;;  %v3395_v26 = vunpack.c.h.s8.bf16 %v53_v17  ;;  %v3427_v27 = vunpack.c.h.s8.bf16 %v61_v19  ;;  %v62_v31 = vld [vmem:[%s4533_s2 + $0xd0] sm:$0xff]  ;;  %v63_v44 = vld [vmem:[%s4533_s2 + $0xd8] sm:$0xff]  ;;  %v72_v50 = vld [vmem:[%s4533_s2 + $0x120] sm:$0xff] }
  0x25   :  { %1437 = vmatmul.mubr.f32.vlgmr.msra.gmra.mrb[0].mxu0 %v4006_v38  ;;  %v3397_v28 = vunpack.c.l.s8.bf16 %v58_v24  ;;  %v3429_v30 = vunpack.c.l.s8.bf16 %v66_v25  ;;  %v3399_v32 = vunpack.c.l.s8.bf16 %v54_v29  ;;  %v3431_v33 = vunpack.c.l.s8.bf16 %v62_v31  ;;  %v67_v38 = vld [vmem:[%s4533_s2 + $0xf8] sm:$0xff]  ;;  %v1190_v45 = vld [vmem:[%s4531_s0 + $0x10] sm:$0xff]  ;;  %v80_v51 = vld [vmem:[%s4533_s2 + $0x160] sm:$0xff] }
  0x26   :  { %1507 = vmatmul.mubr.f32.vlgmr.msra.gmra.mrb[0].mxu1 %v1218_v39  ;;  %3384 = vmatpush3.bf16.msra.mxu0 %v3383_v6  ;;  %v3401_v34 = vunpack.c.h.s8.bf16 %v58_v24  ;;  %v3433_v35 = vunpack.c.h.s8.bf16 %v66_v25  ;;  %v3403_v39 = vunpack.c.h.s8.bf16 %v54_v29  ;;  %v3435_v40 = vunpack.c.h.s8.bf16 %v62_v31  ;;  %v68_v56 = vld [vmem:[%s4533_s2 + $0x100] sm:$0xff]  ;;  %v73_v1 = vld [vmem:[%s4533_s2 + $0x128] sm:$0xff] }
  0x27   :  { %3416 = vmatpush3.bf16.msra.mxu1 %v3415_v7  ;;  %3386 = vmatprep.subr.bf16.mxu0 %v3385_v8  ;;  %v3405_v41 = vunpack.c.l.s8.bf16 %v59_v36  ;;  %v3437_v43 = vunpack.c.l.s8.bf16 %v67_v38  ;;  %v3407_v46 = vunpack.c.l.s8.bf16 %v55_v42  ;;  %v3439_v47 = vunpack.c.l.s8.bf16 %v63_v44  ;;  %v76_v58 = vld [vmem:[%s4533_s2 + $0x140] sm:$0xff]  ;;  %v81_v2 = vld [vmem:[%s4533_s2 + $0x168] sm:$0xff] }
  0x28   :  { %3418 = vmatprep.subr.bf16.mxu1 %v3417_v9  ;;  %1576 = vmatprep.mubr.f32.mxu0 %v1236_v12  ;;  %v3409_v48 = vunpack.c.h.s8.bf16 %v59_v36  ;;  %v3441_v49 = vunpack.c.h.s8.bf16 %v67_v38  ;;  %v1238_v52 = vcombine.high %v1190_v45, %v1190_v45  ;;  %v3411_v53 = vunpack.c.h.s8.bf16 %v55_v42  ;;  %v69_v10 = vld [vmem:[%s4533_s2 + $0x108] sm:$0xff]  ;;  %v96_v42 = vld [vmem:[%s4533_s2 + $0x1e0] sm:$0xff] }
  0x29   :  { %1646 = vmatprep.mubr.f32.mxu1 %v1237_v13  ;;  %v3443_v54 = vunpack.c.h.s8.bf16 %v63_v44  ;;  %v3445_v55 = vunpack.c.l.s8.bf16 %v72_v50  ;;  %v3477_v57 = vunpack.c.l.s8.bf16 %v80_v51  ;;  %v4101_v59 = vrot.slane %v1190_v45, %v4003_v37  ;;  %v77_v12 = vld [vmem:[%s4533_s2 + $0x148] sm:$0xff] }
  0x2a   :  { %3388 = vmatpush3.bf16.msra.mxu0 %v3387_v14  ;;  %v4104_v60 = vrot.slane %v1238_v52, %v4003_v37  ;;  %v3447_v61 = vunpack.c.l.s8.bf16 %v68_v56  ;;  %v3479_v62 = vunpack.c.l.s8.bf16 %v76_v58  ;;  %v3449_v63 = vunpack.c.h.s8.bf16 %v72_v50 }
  0x2b   :  { %3420 = vmatpush3.bf16.msra.mxu1 %v3419_v15  ;;  %3390 = vmatprep.subr.bf16.mxu0 %v3389_v16  ;;  %v3481_v0 = vunpack.c.h.s8.bf16 %v80_v51  ;;  %v1253_v3 = vcombine.high %v4101_v59, %v4101_v59  ;;  %v3451_v7 = vunpack.c.h.s8.bf16 %v68_v56  ;;  %v3483_v8 = vunpack.c.h.s8.bf16 %v76_v58  ;;  %v74_v15 = vld [vmem:[%s4533_s2 + $0x130] sm:$0xff]  ;;  %v89_v56 = vld [vmem:[%s4533_s2 + $0x1a8] sm:$0xff] }
  0x2c   :  { %3422 = vmatprep.subr.bf16.mxu1 %v3421_v18  ;;  %v1254_v6 = vcombine.high %v4104_v60, %v4104_v60  ;;  %v3453_v9 = vunpack.c.l.s8.bf16 %v73_v1  ;;  %v3485_v11 = vunpack.c.l.s8.bf16 %v81_v2  ;;  %v3457_v13 = vunpack.c.h.s8.bf16 %v73_v1  ;;  %v82_v16 = vld [vmem:[%s4533_s2 + $0x170] sm:$0xff]  ;;  %v85_v1 = vld [vmem:[%s4533_s2 + $0x188] sm:$0xff] }
  0x2d   :  { %v3489_v14 = vunpack.c.h.s8.bf16 %v81_v2  ;;  %v3459_v17 = vunpack.c.h.s8.bf16 %v69_v10  ;;  %v3491_v18 = vunpack.c.h.s8.bf16 %v77_v12  ;;  %v3461_v19 = vunpack.c.l.s8.bf16 %v74_v15 }
  0x2e   :  { %3392 = vmatpush3.bf16.msra.mxu0 %v3391_v20  ;;  %v70_v20 = vld [vmem:[%s4533_s2 + $0x110] sm:$0xff]  ;;  %v3465_v25 = vunpack.c.h.s8.bf16 %v74_v15  ;;  %vm2522_vm0 = vcmask 1046528   ;;  %vm3905_vm1 = vmmov 0   ;;  %vm2518_vm2 = vcmask 56320  }
  0x2f   :  { %3424 = vmatpush3.bf16.msra.mxu1 %v3423_v21  ;;  %3394 = vmatprep.subr.bf16.mxu0 %v3393_v22  ;;  %v3493_v21 = vunpack.c.l.s8.bf16 %v82_v16  ;;  %v78_v22 = vld [vmem:[%s4533_s2 + $0x150] sm:$0xff]  ;;  %v3467_v29 = vunpack.c.h.s8.bf16 %v70_v20  ;;  %vm2612_vm3 = vcmask 523264  }
  0x30   :  { %3426 = vmatprep.subr.bf16.mxu1 %v3425_v23  ;;  %v3463_v23 = vunpack.c.l.s8.bf16 %v70_v20  ;;  %v3495_v24 = vunpack.c.l.s8.bf16 %v78_v22 }
  0x32   :  { %3396 = vmatpush3.bf16.msra.mxu0 %v3395_v26  ;;  %v3497_v26 = vunpack.c.h.s8.bf16 %v82_v16 }
  0x33   :  { %3428 = vmatpush3.bf16.msra.mxu1 %v3427_v27  ;;  %3398 = vmatprep.subr.bf16.mxu0 %v3397_v28  ;;  %v75_v27 = vld [vmem:[%s4533_s2 + $0x138] sm:$0xff] }
  0x34   :  { %3430 = vmatprep.subr.bf16.mxu1 %v3429_v30  ;;  %v83_v28 = vld [vmem:[%s4533_s2 + $0x178] sm:$0xff]  ;;  %v3499_v30 = vunpack.c.h.s8.bf16 %v78_v22  ;;  %v3469_v31 = vunpack.c.l.s8.bf16 %v75_v27 }
  0x36   :  { %3400 = vmatpush3.bf16.msra.mxu0 %v3399_v32  ;;  %v71_v32 = vld [vmem:[%s4533_s2 + $0x118] sm:$0xff] }
  0x37   :  { %3432 = vmatpush3.bf16.msra.mxu1 %v3431_v33  ;;  %3402 = vmatprep.subr.bf16.mxu0 %v3401_v34  ;;  %v3501_v33 = vunpack.c.l.s8.bf16 %v83_v28  ;;  %v79_v34 = vld [vmem:[%s4533_s2 + $0x158] sm:$0xff]  ;;  %v3471_v36 = vunpack.c.l.s8.bf16 %v71_v32  ;;  %v3475_v44 = vunpack.c.h.s8.bf16 %v71_v32  ;;  %v112_v32 = vld [vmem:[%s4533_s2 + $0x260] sm:$0xff] }
  0x38   :  { %3434 = vmatprep.subr.bf16.mxu1 %v3433_v35  ;;  %v1191_v35 = vld [vmem:[%s4531_s0 + $0x18] sm:$0xff]  ;;  %v3503_v38 = vunpack.c.l.s8.bf16 %v79_v34  ;;  %v3507_v45 = vunpack.c.h.s8.bf16 %v79_v34 }
  0x39   :  { %v4164_v50 = vrot.slane %v1191_v35, %v4003_v37 }
  0x3a   :  { %3404 = vmatpush3.bf16.msra.mxu0 %v3403_v39  ;;  %v3473_v39 = vunpack.c.h.s8.bf16 %v75_v27 }
  0x3b   :  { %3436 = vmatpush3.bf16.msra.mxu1 %v3435_v40  ;;  %3406 = vmatprep.subr.bf16.mxu0 %v3405_v41  ;;  %v3505_v40 = vunpack.c.h.s8.bf16 %v83_v28  ;;  %v88_v41 = vld [vmem:[%s4533_s2 + $0x1a0] sm:$0xff]  ;;  %v1270_v58 = vcombine.high %v4164_v50, %v4164_v50 }
  0x3c   :  { %3438 = vmatprep.subr.bf16.mxu1 %v3437_v43  ;;  %v1255_v43 = vcombine.high %v1191_v35, %v1191_v35 }
  0x3e   :  { %3408 = vmatpush3.bf16.msra.mxu0 %v3407_v46  ;;  %v3509_v46 = vunpack.c.l.s8.bf16 %v88_v41  ;;  %v4167_v51 = vrot.slane %v1255_v43, %v4003_v37 }
  0x3f   :  { %3440 = vmatpush3.bf16.msra.mxu1 %v3439_v47  ;;  %3410 = vmatprep.subr.bf16.mxu0 %v3409_v48  ;;  %v84_v47 = vld [vmem:[%s4533_s2 + $0x180] sm:$0xff]  ;;  %v3541_v48 = vunpack.c.l.s8.bf16 %v96_v42 }
  0x40   :  { %3442 = vmatprep.subr.bf16.mxu1 %v3441_v49  ;;  %v92_v49 = vld [vmem:[%s4533_s2 + $0x1c0] sm:$0xff]  ;;  %v3511_v52 = vunpack.c.l.s8.bf16 %v84_v47 }
  0x42   :  { %3412 = vmatpush3.bf16.msra.mxu0 %v3411_v53  ;;  %v3543_v53 = vunpack.c.l.s8.bf16 %v92_v49 }
  0x43   :  { %3444 = vmatpush3.bf16.msra.mxu1 %v3443_v54  ;;  %3446 = vmatprep.subr.bf16.mxu0 %v3445_v55  ;;  %v3513_v54 = vunpack.c.h.s8.bf16 %v88_v41  ;;  %v3545_v55 = vunpack.c.h.s8.bf16 %v96_v42 }
  0x44   :  { %3478 = vmatprep.subr.bf16.mxu1 %v3477_v57  ;;  %v97_v57 = vld [vmem:[%s4533_s2 + $0x1e8] sm:$0xff] }
  0x45   :  { %1577 = vmatmul.mubr.f32.vlgmr.msra.gmra.mrb[2].mxu0 %v4039_v4  ;;  %v3455_v4 = vunpack.c.l.s8.bf16 %v69_v10  ;;  %v3549_v2 = vunpack.c.l.s8.bf16 %v97_v57  ;;  %v3523_v10 = vunpack.c.h.s8.bf16 %v85_v1 }
  0x46   :  { %1647 = vmatmul.mubr.f32.vlgmr.msra.gmra.mrb[2].mxu1 %v4042_v5  ;;  %3448 = vmatpush3.bf16.msra.mxu0 %v3447_v61  ;;  %v3487_v5 = vunpack.c.l.s8.bf16 %v77_v12  ;;  %v1271_v61 = vcombine.high %v4167_v51, %v4167_v51 }
  0x47   :  { %3480 = vmatpush3.bf16.msra.mxu1 %v3479_v62  ;;  %3450 = vmatprep.subr.bf16.mxu0 %v3449_v63  ;;  %v3515_v62 = vunpack.c.h.s8.bf16 %v84_v47  ;;  %v3547_v63 = vunpack.c.h.s8.bf16 %v92_v49  ;;  %v105_v47 = vld [vmem:[%s4533_s2 + $0x228] sm:$0xff] }
  0x48   :  { %3482 = vmatprep.subr.bf16.mxu1 %v3481_v0  ;;  %1716 = vmatprep.mubr.f32.mxu0 %v1253_v3  ;;  %v3517_v0 = vunpack.c.l.s8.bf16 %v89_v56  ;;  %v93_v3 = vld [vmem:[%s4533_s2 + $0x1c8] sm:$0xff] }
  0x49   :  { %1786 = vmatprep.mubr.f32.mxu1 %v1254_v6  ;;  %v3521_v6 = vunpack.c.h.s8.bf16 %v89_v56  ;;  %v101_v56 = vld [vmem:[%s4533_s2 + $0x208] sm:$0xff] }
  0x4a   :  { %3452 = vmatpush3.bf16.msra.mxu0 %v3451_v7  ;;  %v3553_v7 = vunpack.c.h.s8.bf16 %v97_v57 }
  0x4b   :  { %3484 = vmatpush3.bf16.msra.mxu1 %v3483_v8  ;;  %3454 = vmatprep.subr.bf16.mxu0 %v3453_v9  ;;  %v90_v8 = vld [vmem:[%s4533_s2 + $0x1b0] sm:$0xff] }
  0x4c   :  { %3486 = vmatprep.subr.bf16.mxu1 %v3485_v11  ;;  %v98_v9 = vld [vmem:[%s4533_s2 + $0x1f0] sm:$0xff]  ;;  %v3555_v11 = vunpack.c.h.s8.bf16 %v93_v3  ;;  %v3525_v12 = vunpack.c.l.s8.bf16 %v90_v8  ;;  %v3529_v16 = vunpack.c.h.s8.bf16 %v90_v8 }
  0x4e   :  { %3456 = vmatpush3.bf16.msra.mxu0 %v3455_v4  ;;  %v86_v4 = vld [vmem:[%s4533_s2 + $0x190] sm:$0xff] }
  0x4f   :  { %3488 = vmatpush3.bf16.msra.mxu1 %v3487_v5  ;;  %3458 = vmatprep.subr.bf16.mxu0 %v3457_v13  ;;  %v3557_v5 = vunpack.c.l.s8.bf16 %v98_v9  ;;  %v94_v13 = vld [vmem:[%s4533_s2 + $0x1d0] sm:$0xff]  ;;  %v3531_v20 = vunpack.c.h.s8.bf16 %v86_v4 }
  0x50   :  { %3490 = vmatprep.subr.bf16.mxu1 %v3489_v14  ;;  %v3527_v14 = vunpack.c.l.s8.bf16 %v86_v4  ;;  %v3559_v15 = vunpack.c.l.s8.bf16 %v94_v13 }
  0x52   :  { %3460 = vmatpush3.bf16.msra.mxu0 %v3459_v17  ;;  %v3561_v17 = vunpack.c.h.s8.bf16 %v98_v9 }
  0x53   :  { %3492 = vmatpush3.bf16.msra.mxu1 %v3491_v18  ;;  %3462 = vmatprep.subr.bf16.mxu0 %v3461_v19  ;;  %v91_v18 = vld [vmem:[%s4533_s2 + $0x1b8] sm:$0xff] }
  0x54   :  { %3494 = vmatprep.subr.bf16.mxu1 %v3493_v21  ;;  %v99_v19 = vld [vmem:[%s4533_s2 + $0x1f8] sm:$0xff]  ;;  %v3563_v21 = vunpack.c.h.s8.bf16 %v94_v13  ;;  %v3533_v22 = vunpack.c.l.s8.bf16 %v91_v18 }
  0x56   :  { %3464 = vmatpush3.bf16.msra.mxu0 %v3463_v23  ;;  %v87_v23 = vld [vmem:[%s4533_s2 + $0x198] sm:$0xff] }
  0x57   :  { %3496 = vmatpush3.bf16.msra.mxu1 %v3495_v24  ;;  %3466 = vmatprep.subr.bf16.mxu0 %v3465_v25  ;;  %v3565_v24 = vunpack.c.l.s8.bf16 %v99_v19  ;;  %v95_v25 = vld [vmem:[%s4533_s2 + $0x1d8] sm:$0xff]  ;;  %v3535_v27 = vunpack.c.l.s8.bf16 %v87_v23  ;;  %v3539_v34 = vunpack.c.h.s8.bf16 %v87_v23  ;;  %v128_v23 = vld [vmem:[%s4533_s2 + $0x2e0] sm:$0xff] }
  0x58   :  { %3498 = vmatprep.subr.bf16.mxu1 %v3497_v26  ;;  %v1192_v26 = vld [vmem:[%s4531_s0 + $0x20] sm:$0xff]  ;;  %v3567_v28 = vunpack.c.l.s8.bf16 %v95_v25  ;;  %v3571_v35 = vunpack.c.h.s8.bf16 %v95_v25 }
  0x59   :  { %v4227_v41 = vrot.slane %v1192_v26, %v4003_v37 }
  0x5a   :  { %3468 = vmatpush3.bf16.msra.mxu0 %v3467_v29  ;;  %v3537_v29 = vunpack.c.h.s8.bf16 %v91_v18 }
  0x5b   :  { %3500 = vmatpush3.bf16.msra.mxu1 %v3499_v30  ;;  %3470 = vmatprep.subr.bf16.mxu0 %v3469_v31  ;;  %v3569_v30 = vunpack.c.h.s8.bf16 %v99_v19  ;;  %v104_v31 = vld [vmem:[%s4533_s2 + $0x220] sm:$0xff]  ;;  %v1287_v49 = vcombine.high %v4227_v41, %v4227_v41 }
  0x5c   :  { %3502 = vmatprep.subr.bf16.mxu1 %v3501_v33  ;;  %v1272_v33 = vcombine.high %v1192_v26, %v1192_v26 }
  0x5e   :  { %3472 = vmatpush3.bf16.msra.mxu0 %v3471_v36  ;;  %v3573_v36 = vunpack.c.l.s8.bf16 %v104_v31  ;;  %v4230_v42 = vrot.slane %v1272_v33, %v4003_v37 }
  0x5f   :  { %3504 = vmatpush3.bf16.msra.mxu1 %v3503_v38  ;;  %3474 = vmatprep.subr.bf16.mxu0 %v3473_v39  ;;  %v100_v38 = vld [vmem:[%s4533_s2 + $0x200] sm:$0xff]  ;;  %v3605_v39 = vunpack.c.l.s8.bf16 %v112_v32 }
  0x60   :  { %3506 = vmatprep.subr.bf16.mxu1 %v3505_v40  ;;  %v108_v40 = vld [vmem:[%s4533_s2 + $0x240] sm:$0xff]  ;;  %v3575_v43 = vunpack.c.l.s8.bf16 %v100_v38 }
  0x62   :  { %3476 = vmatpush3.bf16.msra.mxu0 %v3475_v44  ;;  %v3607_v44 = vunpack.c.l.s8.bf16 %v108_v40 }
  0x63   :  { %3508 = vmatpush3.bf16.msra.mxu1 %v3507_v45  ;;  %3510 = vmatprep.subr.bf16.mxu0 %v3509_v46  ;;  %v3577_v45 = vunpack.c.h.s8.bf16 %v104_v31  ;;  %v3609_v46 = vunpack.c.h.s8.bf16 %v112_v32 }
  0x64   :  { %3542 = vmatprep.subr.bf16.mxu1 %v3541_v48  ;;  %v113_v48 = vld [vmem:[%s4533_s2 + $0x268] sm:$0xff] }
  0x65   :  { %1717 = vmatmul.mubr.f32.vlgmr.msra.gmra.mrb[4].mxu0 %v4101_v59  ;;  %v3519_v59 = vunpack.c.l.s8.bf16 %v85_v1  ;;  %v3613_v57 = vunpack.c.l.s8.bf16 %v113_v48  ;;  %v3587_v1 = vunpack.c.h.s8.bf16 %v101_v56 }
  0x66   :  { %1787 = vmatmul.mubr.f32.vlgmr.msra.gmra.mrb[4].mxu1 %v4104_v60  ;;  %3512 = vmatpush3.bf16.msra.mxu0 %v3511_v52  ;;  %v3551_v60 = vunpack.c.l.s8.bf16 %v93_v3  ;;  %v1288_v52 = vcombine.high %v4230_v42, %v4230_v42 }
  0x67   :  { %3544 = vmatpush3.bf16.msra.mxu1 %v3543_v53  ;;  %3514 = vmatprep.subr.bf16.mxu0 %v3513_v54  ;;  %v3579_v53 = vunpack.c.h.s8.bf16 %v100_v38  ;;  %v3611_v54 = vunpack.c.h.s8.bf16 %v108_v40  ;;  %v121_v38 = vld [vmem:[%s4533_s2 + $0x2a8] sm:$0xff] }
  0x68   :  { %3546 = vmatprep.subr.bf16.mxu1 %v3545_v55  ;;  %1856 = vmatprep.mubr.f32.mxu0 %v1270_v58  ;;  %v3581_v55 = vunpack.c.l.s8.bf16 %v105_v47  ;;  %v109_v58 = vld [vmem:[%s4533_s2 + $0x248] sm:$0xff] }
  0x69   :  { %1926 = vmatprep.mubr.f32.mxu1 %v1271_v61  ;;  %v3585_v61 = vunpack.c.h.s8.bf16 %v105_v47  ;;  %v117_v47 = vld [vmem:[%s4533_s2 + $0x288] sm:$0xff] }
  0x6a   :  { %3516 = vmatpush3.bf16.msra.mxu0 %v3515_v62  ;;  %v3617_v62 = vunpack.c.h.s8.bf16 %v113_v48 }
  0x6b   :  { %3548 = vmatpush3.bf16.msra.mxu1 %v3547_v63  ;;  %3518 = vmatprep.subr.bf16.mxu0 %v3517_v0  ;;  %v106_v63 = vld [vmem:[%s4533_s2 + $0x230] sm:$0xff] }
  0x6c   :  { %3550 = vmatprep.subr.bf16.mxu1 %v3549_v2  ;;  %v114_v0 = vld [vmem:[%s4533_s2 + $0x270] sm:$0xff]  ;;  %v3619_v2 = vunpack.c.h.s8.bf16 %v109_v58  ;;  %v3589_v3 = vunpack.c.l.s8.bf16 %v106_v63  ;;  %v3593_v9 = vunpack.c.h.s8.bf16 %v106_v63 }
  0x6e   :  { %3520 = vmatpush3.bf16.msra.mxu0 %v3519_v59  ;;  %v102_v59 = vld [vmem:[%s4533_s2 + $0x210] sm:$0xff] }
  0x6f   :  { %3552 = vmatpush3.bf16.msra.mxu1 %v3551_v60  ;;  %3522 = vmatprep.subr.bf16.mxu0 %v3521_v6  ;;  %v3621_v60 = vunpack.c.l.s8.bf16 %v114_v0  ;;  %v110_v6 = vld [vmem:[%s4533_s2 + $0x250] sm:$0xff]  ;;  %v3595_v4 = vunpack.c.h.s8.bf16 %v102_v59 }
  0x70   :  { %3554 = vmatprep.subr.bf16.mxu1 %v3553_v7  ;;  %v3591_v7 = vunpack.c.l.s8.bf16 %v102_v59  ;;  %v3623_v8 = vunpack.c.l.s8.bf16 %v110_v6 }
  0x72   :  { %3524 = vmatpush3.bf16.msra.mxu0 %v3523_v10  ;;  %v3625_v10 = vunpack.c.h.s8.bf16 %v114_v0 }
  0x73   :  { %3556 = vmatpush3.bf16.msra.mxu1 %v3555_v11  ;;  %3526 = vmatprep.subr.bf16.mxu0 %v3525_v12  ;;  %v107_v11 = vld [vmem:[%s4533_s2 + $0x238] sm:$0xff] }
  0x74   :  { %3558 = vmatprep.subr.bf16.mxu1 %v3557_v5  ;;  %v115_v12 = vld [vmem:[%s4533_s2 + $0x278] sm:$0xff]  ;;  %v3627_v5 = vunpack.c.h.s8.bf16 %v110_v6  ;;  %v3597_v13 = vunpack.c.l.s8.bf16 %v107_v11 }
  0x76   :  { %3528 = vmatpush3.bf16.msra.mxu0 %v3527_v14  ;;  %v103_v14 = vld [vmem:[%s4533_s2 + $0x218] sm:$0xff] }
  0x77   :  { %3560 = vmatpush3.bf16.msra.mxu1 %v3559_v15  ;;  %3530 = vmatprep.subr.bf16.mxu0 %v3529_v16  ;;  %v3629_v15 = vunpack.c.l.s8.bf16 %v115_v12  ;;  %v111_v16 = vld [vmem:[%s4533_s2 + $0x258] sm:$0xff]  ;;  %v3599_v18 = vunpack.c.l.s8.bf16 %v103_v14  ;;  %v3603_v25 = vunpack.c.h.s8.bf16 %v103_v14  ;;  %v144_v14 = vld [vmem:[%s4533_s2 + $0x360] sm:$0xff] }
  0x78   :  { %3562 = vmatprep.subr.bf16.mxu1 %v3561_v17  ;;  %v1193_v17 = vld [vmem:[%s4531_s0 + $0x28] sm:$0xff]  ;;  %v3631_v19 = vunpack.c.l.s8.bf16 %v111_v16  ;;  %v3635_v26 = vunpack.c.h.s8.bf16 %v111_v16 }
  0x79   :  { %v4290_v31 = vrot.slane %v1193_v17, %v4003_v37 }
  0x7a   :  { %3532 = vmatpush3.bf16.msra.mxu0 %v3531_v20  ;;  %v3601_v20 = vunpack.c.h.s8.bf16 %v107_v11 }
  0x7b   :  { %3564 = vmatpush3.bf16.msra.mxu1 %v3563_v21  ;;  %3534 = vmatprep.subr.bf16.mxu0 %v3533_v22  ;;  %v3633_v21 = vunpack.c.h.s8.bf16 %v115_v12  ;;  %v120_v22 = vld [vmem:[%s4533_s2 + $0x2a0] sm:$0xff]  ;;  %v1304_v40 = vcombine.high %v4290_v31, %v4290_v31 }
  0x7c   :  { %3566 = vmatprep.subr.bf16.mxu1 %v3565_v24  ;;  %v1289_v24 = vcombine.high %v1193_v17, %v1193_v17 }
  0x7e   :  { %3536 = vmatpush3.bf16.msra.mxu0 %v3535_v27  ;;  %v3637_v27 = vunpack.c.l.s8.bf16 %v120_v22  ;;  %v4293_v32 = vrot.slane %v1289_v24, %v4003_v37 }
  0x7f   :  { %3568 = vmatpush3.bf16.msra.mxu1 %v3567_v28  ;;  %3538 = vmatprep.subr.bf16.mxu0 %v3537_v29  ;;  %v116_v28 = vld [vmem:[%s4533_s2 + $0x280] sm:$0xff]  ;;  %v3669_v29 = vunpack.c.l.s8.bf16 %v128_v23 }
  0x80   :  { %3570 = vmatprep.subr.bf16.mxu1 %v3569_v30  ;;  %v124_v30 = vld [vmem:[%s4533_s2 + $0x2c0] sm:$0xff]  ;;  %v3639_v33 = vunpack.c.l.s8.bf16 %v116_v28 }
  0x82   :  { %3540 = vmatpush3.bf16.msra.mxu0 %v3539_v34  ;;  %v3671_v34 = vunpack.c.l.s8.bf16 %v124_v30 }
  0x83   :  { %3572 = vmatpush3.bf16.msra.mxu1 %v3571_v35  ;;  %3574 = vmatprep.subr.bf16.mxu0 %v3573_v36  ;;  %v3641_v35 = vunpack.c.h.s8.bf16 %v120_v22  ;;  %v3673_v36 = vunpack.c.h.s8.bf16 %v128_v23 }
  0x84   :  { %3606 = vmatprep.subr.bf16.mxu1 %v3605_v39  ;;  %v129_v39 = vld [vmem:[%s4533_s2 + $0x2e8] sm:$0xff] }
  0x85   :  { %1857 = vmatmul.mubr.f32.vlgmr.msra.gmra.mrb[6].mxu0 %v4164_v50  ;;  %v3583_v50 = vunpack.c.l.s8.bf16 %v101_v56  ;;  %v3677_v48 = vunpack.c.l.s8.bf16 %v129_v39  ;;  %v3651_v56 = vunpack.c.h.s8.bf16 %v117_v47 }
  0x86   :  { %1927 = vmatmul.mubr.f32.vlgmr.msra.gmra.mrb[6].mxu1 %v4167_v51  ;;  %3576 = vmatpush3.bf16.msra.mxu0 %v3575_v43  ;;  %v3615_v51 = vunpack.c.l.s8.bf16 %v109_v58  ;;  %v1305_v43 = vcombine.high %v4293_v32, %v4293_v32 }
  0x87   :  { %3608 = vmatpush3.bf16.msra.mxu1 %v3607_v44  ;;  %3578 = vmatprep.subr.bf16.mxu0 %v3577_v45  ;;  %v3643_v44 = vunpack.c.h.s8.bf16 %v116_v28  ;;  %v3675_v45 = vunpack.c.h.s8.bf16 %v124_v30  ;;  %v137_v28 = vld [vmem:[%s4533_s2 + $0x328] sm:$0xff] }
  0x88   :  { %3610 = vmatprep.subr.bf16.mxu1 %v3609_v46  ;;  %1996 = vmatprep.mubr.f32.mxu0 %v1287_v49  ;;  %v3645_v46 = vunpack.c.l.s8.bf16 %v121_v38  ;;  %v125_v49 = vld [vmem:[%s4533_s2 + $0x2c8] sm:$0xff] }
  0x89   :  { %2066 = vmatprep.mubr.f32.mxu1 %v1288_v52  ;;  %v3649_v52 = vunpack.c.h.s8.bf16 %v121_v38  ;;  %v133_v38 = vld [vmem:[%s4533_s2 + $0x308] sm:$0xff] }
  0x8a   :  { %3580 = vmatpush3.bf16.msra.mxu0 %v3579_v53  ;;  %v3681_v53 = vunpack.c.h.s8.bf16 %v129_v39 }
  0x8b   :  { %3612 = vmatpush3.bf16.msra.mxu1 %v3611_v54  ;;  %3582 = vmatprep.subr.bf16.mxu0 %v3581_v55  ;;  %v122_v54 = vld [vmem:[%s4533_s2 + $0x2b0] sm:$0xff] }
  0x8c   :  { %3614 = vmatprep.subr.bf16.mxu1 %v3613_v57  ;;  %v130_v55 = vld [vmem:[%s4533_s2 + $0x2f0] sm:$0xff]  ;;  %v3683_v57 = vunpack.c.h.s8.bf16 %v125_v49  ;;  %v3653_v58 = vunpack.c.l.s8.bf16 %v122_v54  ;;  %v3657_v0 = vunpack.c.h.s8.bf16 %v122_v54 }
  0x8e   :  { %3584 = vmatpush3.bf16.msra.mxu0 %v3583_v50  ;;  %v118_v50 = vld [vmem:[%s4533_s2 + $0x290] sm:$0xff] }
  0x8f   :  { %3616 = vmatpush3.bf16.msra.mxu1 %v3615_v51  ;;  %3586 = vmatprep.subr.bf16.mxu0 %v3585_v61  ;;  %v3685_v51 = vunpack.c.l.s8.bf16 %v130_v55  ;;  %v126_v61 = vld [vmem:[%s4533_s2 + $0x2d0] sm:$0xff]  ;;  %v3659_v59 = vunpack.c.h.s8.bf16 %v118_v50 }
  0x90   :  { %3618 = vmatprep.subr.bf16.mxu1 %v3617_v62  ;;  %v3655_v62 = vunpack.c.l.s8.bf16 %v118_v50  ;;  %v3687_v63 = vunpack.c.l.s8.bf16 %v126_v61 }
  0x92   :  { %3588 = vmatpush3.bf16.msra.mxu0 %v3587_v1  ;;  %v3689_v1 = vunpack.c.h.s8.bf16 %v130_v55 }
  0x93   :  { %3620 = vmatpush3.bf16.msra.mxu1 %v3619_v2  ;;  %3590 = vmatprep.subr.bf16.mxu0 %v3589_v3  ;;  %v123_v2 = vld [vmem:[%s4533_s2 + $0x2b8] sm:$0xff] }
  0x94   :  { %3622 = vmatprep.subr.bf16.mxu1 %v3621_v60  ;;  %v131_v3 = vld [vmem:[%s4533_s2 + $0x2f8] sm:$0xff]  ;;  %v3691_v60 = vunpack.c.h.s8.bf16 %v126_v61  ;;  %v3661_v6 = vunpack.c.l.s8.bf16 %v123_v2 }
  0x96   :  { %3592 = vmatpush3.bf16.msra.mxu0 %v3591_v7  ;;  %v119_v7 = vld [vmem:[%s4533_s2 + $0x298] sm:$0xff] }
  0x97   :  { %3624 = vmatpush3.bf16.msra.mxu1 %v3623_v8  ;;  %3594 = vmatprep.subr.bf16.mxu0 %v3593_v9  ;;  %v3693_v8 = vunpack.c.l.s8.bf16 %v131_v3  ;;  %v127_v9 = vld [vmem:[%s4533_s2 + $0x2d8] sm:$0xff]  ;;  %v3663_v11 = vunpack.c.l.s8.bf16 %v119_v7  ;;  %v3667_v16 = vunpack.c.h.s8.bf16 %v119_v7  ;;  %v160_v7 = vld [vmem:[%s4533_s2 + $0x3e0] sm:$0xff] }
  0x98   :  { %3626 = vmatprep.subr.bf16.mxu1 %v3625_v10  ;;  %v1194_v10 = vld [vmem:[%s4531_s0 + $0x30] sm:$0xff]  ;;  %v3695_v12 = vunpack.c.l.s8.bf16 %v127_v9  ;;  %v3699_v17 = vunpack.c.h.s8.bf16 %v127_v9 }
  0x99   :  { %v4353_v22 = vrot.slane %v1194_v10, %v4003_v37 }
  0x9a   :  { %3596 = vmatpush3.bf16.msra.mxu0 %v3595_v4  ;;  %v3665_v4 = vunpack.c.h.s8.bf16 %v123_v2 }
  0x9b   :  { %3628 = vmatpush3.bf16.msra.mxu1 %v3627_v5  ;;  %3598 = vmatprep.subr.bf16.mxu0 %v3597_v13  ;;  %v3697_v5 = vunpack.c.h.s8.bf16 %v131_v3  ;;  %v136_v13 = vld [vmem:[%s4533_s2 + $0x320] sm:$0xff]  ;;  %v1321_v30 = vcombine.high %v4353_v22, %v4353_v22 }
  0x9c   :  { %3630 = vmatprep.subr.bf16.mxu1 %v3629_v15  ;;  %v1306_v15 = vcombine.high %v1194_v10, %v1194_v10 }
  0x9e   :  { %3600 = vmatpush3.bf16.msra.mxu0 %v3599_v18  ;;  %v3701_v18 = vunpack.c.l.s8.bf16 %v136_v13  ;;  %v4356_v23 = vrot.slane %v1306_v15, %v4003_v37 }
  0x9f   :  { %3632 = vmatpush3.bf16.msra.mxu1 %v3631_v19  ;;  %3602 = vmatprep.subr.bf16.mxu0 %v3601_v20  ;;  %v132_v19 = vld [vmem:[%s4533_s2 + $0x300] sm:$0xff]  ;;  %v3733_v20 = vunpack.c.l.s8.bf16 %v144_v14 }
  0xa0   :  { %3634 = vmatprep.subr.bf16.mxu1 %v3633_v21  ;;  %v140_v21 = vld [vmem:[%s4533_s2 + $0x340] sm:$0xff]  ;;  %v3703_v24 = vunpack.c.l.s8.bf16 %v132_v19 }
  0xa2   :  { %3604 = vmatpush3.bf16.msra.mxu0 %v3603_v25  ;;  %v3735_v25 = vunpack.c.l.s8.bf16 %v140_v21 }
  0xa3   :  { %3636 = vmatpush3.bf16.msra.mxu1 %v3635_v26  ;;  %3638 = vmatprep.subr.bf16.mxu0 %v3637_v27  ;;  %v3705_v26 = vunpack.c.h.s8.bf16 %v136_v13  ;;  %v3737_v27 = vunpack.c.h.s8.bf16 %v144_v14 }
  0xa4   :  { %3670 = vmatprep.subr.bf16.mxu1 %v3669_v29  ;;  %v145_v29 = vld [vmem:[%s4533_s2 + $0x368] sm:$0xff] }
  0xa5   :  { %1997 = vmatmul.mubr.f32.vlgmr.msra.gmra.mrb[8].mxu0 %v4227_v41  ;;  %v3647_v41 = vunpack.c.l.s8.bf16 %v117_v47  ;;  %v3741_v39 = vunpack.c.l.s8.bf16 %v145_v29  ;;  %v3715_v47 = vunpack.c.h.s8.bf16 %v133_v38 }
  0xa6   :  { %2067 = vmatmul.mubr.f32.vlgmr.msra.gmra.mrb[8].mxu1 %v4230_v42  ;;  %3640 = vmatpush3.bf16.msra.mxu0 %v3639_v33  ;;  %v3679_v42 = vunpack.c.l.s8.bf16 %v125_v49  ;;  %v1322_v33 = vcombine.high %v4356_v23, %v4356_v23 }
  0xa7   :  { %3672 = vmatpush3.bf16.msra.mxu1 %v3671_v34  ;;  %3642 = vmatprep.subr.bf16.mxu0 %v3641_v35  ;;  %v3707_v34 = vunpack.c.h.s8.bf16 %v132_v19  ;;  %v3739_v35 = vunpack.c.h.s8.bf16 %v140_v21  ;;  %v153_v19 = vld [vmem:[%s4533_s2 + $0x3a8] sm:$0xff] }
  0xa8   :  { %3674 = vmatprep.subr.bf16.mxu1 %v3673_v36  ;;  %2136 = vmatprep.mubr.f32.mxu0 %v1304_v40  ;;  %v3709_v36 = vunpack.c.l.s8.bf16 %v137_v28  ;;  %v141_v40 = vld [vmem:[%s4533_s2 + $0x348] sm:$0xff] }
  0xa9   :  { %2206 = vmatprep.mubr.f32.mxu1 %v1305_v43  ;;  %v3713_v43 = vunpack.c.h.s8.bf16 %v137_v28 }
  0xaa   :  { %3644 = vmatpush3.bf16.msra.mxu0 %v3643_v44  ;;  %v3745_v44 = vunpack.c.h.s8.bf16 %v145_v29  ;;  %v157_v29 = vld [vmem:[%s4533_s2 + $0x3c8] sm:$0xff] }
  0xab   :  { %3676 = vmatpush3.bf16.msra.mxu1 %v3675_v45  ;;  %3646 = vmatprep.subr.bf16.mxu0 %v3645_v46  ;;  %v138_v45 = vld [vmem:[%s4533_s2 + $0x330] sm:$0xff] }
  0xac   :  { %3678 = vmatprep.subr.bf16.mxu1 %v3677_v48  ;;  %v146_v46 = vld [vmem:[%s4533_s2 + $0x370] sm:$0xff]  ;;  %v3747_v48 = vunpack.c.h.s8.bf16 %v141_v40  ;;  %v3717_v49 = vunpack.c.l.s8.bf16 %v138_v45  ;;  %v3721_v55 = vunpack.c.h.s8.bf16 %v138_v45 }
  0xae   :  { %3648 = vmatpush3.bf16.msra.mxu0 %v3647_v41  ;;  %v134_v41 = vld [vmem:[%s4533_s2 + $0x310] sm:$0xff] }
  0xaf   :  { %3680 = vmatpush3.bf16.msra.mxu1 %v3679_v42  ;;  %3650 = vmatprep.subr.bf16.mxu0 %v3649_v52  ;;  %v3749_v42 = vunpack.c.l.s8.bf16 %v146_v46  ;;  %v142_v52 = vld [vmem:[%s4533_s2 + $0x350] sm:$0xff]  ;;  %v3723_v50 = vunpack.c.h.s8.bf16 %v134_v41 }
  0xb0   :  { %3682 = vmatprep.subr.bf16.mxu1 %v3681_v53  ;;  %v3719_v53 = vunpack.c.l.s8.bf16 %v134_v41  ;;  %v3751_v54 = vunpack.c.l.s8.bf16 %v142_v52 }
  0xb2   :  { %3652 = vmatpush3.bf16.msra.mxu0 %v3651_v56  ;;  %v3753_v56 = vunpack.c.h.s8.bf16 %v146_v46 }
  0xb3   :  { %3684 = vmatpush3.bf16.msra.mxu1 %v3683_v57  ;;  %3654 = vmatprep.subr.bf16.mxu0 %v3653_v58  ;;  %v139_v57 = vld [vmem:[%s4533_s2 + $0x338] sm:$0xff] }
  0xb4   :  { %3686 = vmatprep.subr.bf16.mxu1 %v3685_v51  ;;  %v147_v58 = vld [vmem:[%s4533_s2 + $0x378] sm:$0xff]  ;;  %v3755_v51 = vunpack.c.h.s8.bf16 %v142_v52  ;;  %v3725_v61 = vunpack.c.l.s8.bf16 %v139_v57 }
  0xb5   :  { %v151_v52 = vld [vmem:[%s4533_s2 + $0x398] sm:$0xff] }
  0xb6   :  { %3656 = vmatpush3.bf16.msra.mxu0 %v3655_v62  ;;  %v135_v62 = vld [vmem:[%s4533_s2 + $0x318] sm:$0xff] }
  0xb7   :  { %3688 = vmatpush3.bf16.msra.mxu1 %v3687_v63  ;;  %3658 = vmatprep.subr.bf16.mxu0 %v3657_v0  ;;  %v3757_v63 = vunpack.c.l.s8.bf16 %v147_v58  ;;  %v143_v0 = vld [vmem:[%s4533_s2 + $0x358] sm:$0xff]  ;;  %v3727_v2 = vunpack.c.l.s8.bf16 %v135_v62  ;;  %v3731_v9 = vunpack.c.h.s8.bf16 %v135_v62 }
  0xb8   :  { %3690 = vmatprep.subr.bf16.mxu1 %v3689_v1  ;;  %v1195_v1 = vld [vmem:[%s4531_s0 + $0x38] sm:$0xff]  ;;  %v3759_v3 = vunpack.c.l.s8.bf16 %v143_v0  ;;  %v3763_v10 = vunpack.c.h.s8.bf16 %v143_v0 }
  0xb9   :  { %v4416_v13 = vrot.slane %v1195_v1, %v4003_v37 }
  0xba   :  { %3660 = vmatpush3.bf16.msra.mxu0 %v3659_v59  ;;  %v3729_v59 = vunpack.c.h.s8.bf16 %v139_v57 }
  0xbb   :  { %3692 = vmatpush3.bf16.msra.mxu1 %v3691_v60  ;;  %3662 = vmatprep.subr.bf16.mxu0 %v3661_v6  ;;  %v3761_v60 = vunpack.c.h.s8.bf16 %v147_v58  ;;  %v152_v6 = vld [vmem:[%s4533_s2 + $0x3a0] sm:$0xff] }
  0xbc   :  { %3694 = vmatprep.subr.bf16.mxu1 %v3693_v8  ;;  %v1323_v8 = vcombine.high %v1195_v1, %v1195_v1 }
  0xbe   :  { %3664 = vmatpush3.bf16.msra.mxu0 %v3663_v11  ;;  %v3765_v11 = vunpack.c.l.s8.bf16 %v152_v6  ;;  %v4419_v14 = vrot.slane %v1323_v8, %v4003_v37  ;;  %v1338_v37 = vcombine.high %v4416_v13, %v4416_v13 }
  0xbf   :  { %3696 = vmatpush3.bf16.msra.mxu1 %v3695_v12  ;;  %3666 = vmatprep.subr.bf16.mxu0 %v3665_v4  ;;  %v148_v12 = vld [vmem:[%s4533_s2 + $0x380] sm:$0xff]  ;;  %v3797_v4 = vunpack.c.l.s8.bf16 %v160_v7 }
  0xc0   :  { %3698 = vmatprep.subr.bf16.mxu1 %v3697_v5  ;;  %v156_v5 = vld [vmem:[%s4533_s2 + $0x3c0] sm:$0xff]  ;;  %v3767_v15 = vunpack.c.l.s8.bf16 %v148_v12  ;;  %v1339_v21 = vcombine.high %v4419_v14, %v4419_v14 }
  0xc2   :  { %3668 = vmatpush3.bf16.msra.mxu0 %v3667_v16  ;;  %v3799_v16 = vunpack.c.l.s8.bf16 %v156_v5 }
  0xc3   :  { %3700 = vmatpush3.bf16.msra.mxu1 %v3699_v17  ;;  %3702 = vmatprep.subr.bf16.mxu0 %v3701_v18  ;;  %v3769_v17 = vunpack.c.h.s8.bf16 %v152_v6  ;;  %v3801_v18 = vunpack.c.h.s8.bf16 %v160_v7  ;;  %v2509_v6 = vld [vmem:[%s4532_s1] sm:$0x3] }
  0xc4   :  { %3734 = vmatprep.subr.bf16.mxu1 %v3733_v20  ;;  %v161_v20 = vld [vmem:[%s4533_s2 + $0x3e8] sm:$0xff] }
  0xc5   :  { %2137 = vmatmul.mubr.f32.vlgmr.msra.gmra.mrb[10].mxu0 %v4290_v31  ;;  %v3711_v31 = vunpack.c.l.s8.bf16 %v133_v38  ;;  %v3805_v28 = vunpack.c.l.s8.bf16 %v161_v20  ;;  %v3811_v38 = vunpack.c.h.s8.bf16 %v157_v29 }
  0xc6   :  { %2207 = vmatmul.mubr.f32.vlgmr.msra.gmra.mrb[10].mxu1 %v4293_v32  ;;  %3704 = vmatpush3.bf16.msra.mxu0 %v3703_v24  ;;  %v3743_v32 = vunpack.c.l.s8.bf16 %v141_v40  ;;  %v3771_v24 = vunpack.c.h.s8.bf16 %v148_v12  ;;  %v150_v40 = vld [vmem:[%s4533_s2 + $0x390] sm:$0xff] }
  0xc7   :  { %3736 = vmatpush3.bf16.msra.mxu1 %v3735_v25  ;;  %3706 = vmatprep.subr.bf16.mxu0 %v3705_v26  ;;  %v3803_v25 = vunpack.c.h.s8.bf16 %v156_v5  ;;  %v3773_v26 = vunpack.c.l.s8.bf16 %v153_v19 }
  0xc8   :  { %3738 = vmatprep.subr.bf16.mxu1 %v3737_v27  ;;  %2276 = vmatprep.mubr.f32.mxu0 %v1321_v30  ;;  %v149_v27 = vld [vmem:[%s4533_s2 + $0x388] sm:$0xff]  ;;  %v3777_v30 = vunpack.c.h.s8.bf16 %v153_v19 }
  0xc9   :  { %2346 = vmatprep.mubr.f32.mxu1 %v1322_v33  ;;  %v3809_v33 = vunpack.c.h.s8.bf16 %v161_v20 }
  0xca   :  { %3708 = vmatpush3.bf16.msra.mxu0 %v3707_v34  ;;  %v154_v34 = vld [vmem:[%s4533_s2 + $0x3b0] sm:$0xff] }
  0xcb   :  { %3740 = vmatpush3.bf16.msra.mxu1 %v3739_v35  ;;  %3710 = vmatprep.subr.bf16.mxu0 %v3709_v36  ;;  %v162_v35 = vld [vmem:[%s4533_s2 + $0x3f0] sm:$0xff]  ;;  %v3779_v36 = vunpack.c.h.s8.bf16 %v149_v27  ;;  %v3785_v45 = vunpack.c.h.s8.bf16 %v154_v34 }
  0xcc   :  { %3742 = vmatprep.subr.bf16.mxu1 %v3741_v39  ;;  %v3781_v39 = vunpack.c.l.s8.bf16 %v154_v34  ;;  %v3817_v46 = vunpack.c.h.s8.bf16 %v162_v35 }
  0xce   :  { %3712 = vmatpush3.bf16.msra.mxu0 %v3711_v31  ;;  %v3813_v31 = vunpack.c.l.s8.bf16 %v162_v35 }
  0xcf   :  { %3744 = vmatpush3.bf16.msra.mxu1 %v3743_v32  ;;  %3714 = vmatprep.subr.bf16.mxu0 %v3713_v43  ;;  %v158_v32 = vld [vmem:[%s4533_s2 + $0x3d0] sm:$0xff]  ;;  %v3783_v43 = vunpack.c.l.s8.bf16 %v150_v40 }
  0xd0   :  { %3746 = vmatprep.subr.bf16.mxu1 %v3745_v44  ;;  %v3815_v44 = vunpack.c.l.s8.bf16 %v158_v32  ;;  %v3819_v41 = vunpack.c.h.s8.bf16 %v158_v32 }
  0xd2   :  { %3716 = vmatpush3.bf16.msra.mxu0 %v3715_v47  ;;  %v155_v47 = vld [vmem:[%s4533_s2 + $0x3b8] sm:$0xff] }
  0xd3   :  { %3748 = vmatpush3.bf16.msra.mxu1 %v3747_v48  ;;  %3718 = vmatprep.subr.bf16.mxu0 %v3717_v49  ;;  %v163_v48 = vld [vmem:[%s4533_s2 + $0x3f8] sm:$0xff]  ;;  %v3787_v49 = vunpack.c.h.s8.bf16 %v150_v40 }
  0xd4   :  { %3750 = vmatprep.subr.bf16.mxu1 %v3749_v42  ;;  %v3789_v42 = vunpack.c.l.s8.bf16 %v155_v47  ;;  %v3825_v0 = vunpack.c.h.s8.bf16 %v163_v48  ;;  %v2604_v40 = vld [vmem:[%s4538_s7 + $0x38] sm:$0xff] }
  0xd6   :  { %3720 = vmatpush3.bf16.msra.mxu0 %v3719_v53  ;;  %v3821_v53 = vunpack.c.l.s8.bf16 %v163_v48 }
  0xd7   :  { %3752 = vmatpush3.bf16.msra.mxu1 %v3751_v54  ;;  %3722 = vmatprep.subr.bf16.mxu0 %v3721_v55  ;;  %v159_v54 = vld [vmem:[%s4533_s2 + $0x3d8] sm:$0xff] }
  0xd8   :  { %3754 = vmatprep.subr.bf16.mxu1 %v3753_v56  ;;  %v3823_v62 = vunpack.c.l.s8.bf16 %v159_v54 }
  0xda   :  { %3724 = vmatpush3.bf16.msra.mxu0 %v3723_v50 }
  0xdb   :  { %3756 = vmatpush3.bf16.msra.mxu1 %v3755_v51  ;;  %3726 = vmatprep.subr.bf16.mxu0 %v3725_v61  ;;  %v3791_v61 = vunpack.c.l.s8.bf16 %v151_v52 }
  0xdc   :  { %3758 = vmatprep.subr.bf16.mxu1 %v3757_v63  ;;  %v3793_v63 = vunpack.c.h.s8.bf16 %v155_v47 }
  0xde   :  { %3728 = vmatpush3.bf16.msra.mxu0 %v3727_v2  ;;  %v3795_v2 = vunpack.c.h.s8.bf16 %v151_v52 }
  0xdf   :  { %3760 = vmatpush3.bf16.msra.mxu1 %v3759_v3  ;;  %3730 = vmatprep.subr.bf16.mxu0 %v3729_v59  ;;  %v3827_v3 = vunpack.c.h.s8.bf16 %v159_v54  ;;  %v3904_v59 = vmov 0.0  }
  0xe0   :  { %3762 = vmatprep.subr.bf16.mxu1 %v3761_v60  ;;  %v2510_v60 = vld [vmem:[%s4536_s5] sm:$0x7f] }
  0xe2   :  { %3732 = vmatpush3.bf16.msra.mxu0 %v3731_v9 }
  0xe3   :  { %3764 = vmatpush3.bf16.msra.mxu1 %v3763_v10  ;;  %3766 = vmatprep.subr.bf16.mxu0 %v3765_v11 }
  0xe4   :  { %3798 = vmatprep.subr.bf16.mxu1 %v3797_v4 }
  0xe5   :  { %2277 = vmatmul.mubr.f32.vlgmr.msra.gmra.mrb[12].mxu0 %v4353_v22  ;;  %v3775_v22 = vunpack.c.l.s8.bf16 %v149_v27  ;;  %v2600_v27 = vld [vmem:[%s4538_s7 + $0x18] sm:$0xff] }
  0xe6   :  { %2347 = vmatmul.mubr.f32.vlgmr.msra.gmra.mrb[12].mxu1 %v4356_v23  ;;  %3768 = vmatpush3.bf16.msra.mxu0 %v3767_v15  ;;  %v3807_v23 = vunpack.c.l.s8.bf16 %v157_v29  ;;  %v2601_v29 = vld [vmem:[%s4538_s7 + $0x20] sm:$0xff] }
  0xe7   :  { %3800 = vmatpush3.bf16.msra.mxu1 %v3799_v16  ;;  %3770 = vmatprep.subr.bf16.mxu0 %v3769_v17 }
  0xe8   :  { %3802 = vmatprep.subr.bf16.mxu1 %v3801_v18  ;;  %2416 = vmatprep.mubr.f32.mxu0 %v1338_v37  ;;  %v2597_v37 = vld [vmem:[%s4538_s7] sm:$0xff] }
  0xe9   :  { %2486 = vmatprep.mubr.f32.mxu1 %v1339_v21  ;;  %v2598_v21 = vld [vmem:[%s4538_s7 + $0x8] sm:$0xff] }
  0xea   :  { %3772 = vmatpush3.bf16.msra.mxu0 %v3771_v24  ;;  %v2599_v24 = vld [vmem:[%s4538_s7 + $0x10] sm:$0xff] }
  0xeb   :  { %3804 = vmatpush3.bf16.msra.mxu1 %v3803_v25  ;;  %3774 = vmatprep.subr.bf16.mxu0 %v3773_v26  ;;  %v3906_v25 = vmov 0.0|0.0   ;;  %v3830_v26 = vpack.c.bf16 %v2598_v21, %v2597_v37 }
  0xec   :  { %3806 = vmatprep.subr.bf16.mxu1 %v3805_v28  ;;  %v3833_v28 = vpack.c.bf16 %v2600_v27, %v2599_v24 }
  0xee   :  { %3776 = vmatpush3.bf16.msra.mxu0 %v3775_v22  ;;  %v2602_v22 = vld [vmem:[%s4538_s7 + $0x28] sm:$0xff] }
  0xef   :  { %3808 = vmatpush3.bf16.msra.mxu1 %v3807_v23  ;;  %3778 = vmatprep.subr.bf16.mxu0 %v3777_v30 }
  0xf0   :  { %3810 = vmatprep.subr.bf16.mxu1 %v3809_v33  ;;  %v3836_v33 = vpack.c.bf16 %v2602_v22, %v2601_v29 }
  0xf2   :  { %3780 = vmatpush3.bf16.msra.mxu0 %v3779_v36 }
  0xf3   :  { %3812 = vmatpush3.bf16.msra.mxu1 %v3811_v38  ;;  %3782 = vmatprep.subr.bf16.mxu0 %v3781_v39  ;;  %v2603_v39 = vld [vmem:[%s4538_s7 + $0x30] sm:$0xff] }
  0xf4   :  { %3814 = vmatprep.subr.bf16.mxu1 %v3813_v31  ;;  %v3839_v32 = vpack.c.bf16 %v2604_v40, %v2603_v39 }
  0xf6   :  { %3784 = vmatpush3.bf16.msra.mxu0 %v3783_v43 }
  0xf7   :  { %3816 = vmatpush3.bf16.msra.mxu1 %v3815_v44  ;;  %3786 = vmatprep.subr.bf16.mxu0 %v3785_v45 }
  0xf8   :  { %3818 = vmatprep.subr.bf16.mxu1 %v3817_v46  ;;  %v2754_v55 = vpop.f32.mrb[0].mxu0 }
  0xf9   :  { %v2789_v56 = vpop.f32.mrb[0].mxu1  ;;  %v2755_v57 = vpop.f32.mrb[1].mxu0 }
  0xfa   :  { %v2790_v58 = vpop.f32.mrb[1].mxu1  ;;  %v2756_v50 = vadd.f32 %v2755_v57, %v2754_v55  ;;  %3788 = vmatpush3.bf16.msra.mxu0 %v3787_v49 }
  0xfb   :  { %v2791_v51 = vadd.f32 %v2790_v58, %v2789_v56  ;;  %3820 = vmatpush3.bf16.msra.mxu1 %v3819_v41  ;;  %3790 = vmatprep.subr.bf16.mxu0 %v3789_v42 }
  0xfc   :  { %3822 = vmatprep.subr.bf16.mxu1 %v3821_v53 }
  0xfd   :  { %v1509_v1 = vadd.f32 %v2791_v51, %v2756_v50 }
  0xfe   :  { %3792 = vmatpush3.bf16.msra.mxu0 %v3791_v61 }
  0xff   :  { %3824 = vmatpush3.bf16.msra.mxu1 %v3823_v62  ;;  %3794 = vmatprep.subr.bf16.mxu0 %v3793_v63 }
 0x100   :  { %3826 = vmatprep.subr.bf16.mxu1 %v3825_v0 }
 0x102   :  { %3796 = vmatpush3.bf16.msra.mxu0 %v3795_v2 }
 0x103   :  { %3828 = vmatpush3.bf16.msra.mxu1 %v3827_v3  ;;  %3293 = vmatprep.subr.mxu0 %v3904_v59 }
 0x104   :  { %3829 = vmatprep.subr.bf16.mxu1 %v3906_v25 }
 0x105   :  { %2417 = vmatmul.mubr.f32.vlgmr.msra.gmra.mrb[14].mxu0 %v4416_v13 }
 0x106   :  { %2487 = vmatmul.mubr.f32.vlgmr.msra.gmra.mrb[14].mxu1 %v4419_v14  ;;  %3294 = vmatpush3.msk.msra.mxu0 %vm2522_vm0, %v2510_v60 }
 0x107   :  { %3295 = vmatprep.mubr.msk.f32.mxu0 %vm3905_vm1, %v3904_v59  ;;  %3314 = vmatprep.mubr.msk.f32.mxu1 %vm3905_vm1, %v3904_v59 }
 0x108   :  { %3831 = vmatpush3.bf16.msra.mxu1 %v3830_v26 }
 0x109   :  { %3296 = vmatmul.mubr.msk.f32.vlgmr.msra.gmra.mrb[16].mxu0 %vm2518_vm2, %v2509_v6  ;;  %3832 = vmatprep.subr.bf16.mxu1 %v3906_v25 }
 0x10c   :  { %3834 = vmatpush3.bf16.msra.mxu1 %v3833_v28 }
 0x10d   :  { %3835 = vmatprep.subr.bf16.mxu1 %v3906_v25 }
 0x110   :  { %3837 = vmatpush3.bf16.msra.mxu1 %v3836_v33 }
 0x111   :  { %3838 = vmatprep.subr.bf16.mxu1 %v3906_v25 }
 0x114   :  { %3840 = vmatpush3.bf16.msra.mxu1 %v3839_v32 }
 0x118   :  { %v2824_v7 = vpop.f32.mrb[2].mxu0 }
 0x119   :  { %v2859_v8 = vpop.f32.mrb[2].mxu1  ;;  %v2825_v9 = vpop.f32.mrb[3].mxu0 }
 0x11a   :  { %v2860_v10 = vpop.f32.mrb[3].mxu1  ;;  %v2826_v11 = vadd.f32 %v2825_v9, %v2824_v7 }
 0x11b   :  { %v2861_v12 = vadd.f32 %v2860_v10, %v2859_v8  ;;  %v2717_v10 = vld [vmem:[%s4537_s6] ss:$0 sm:$0xff]  ;;  %s3907_s6 = smov [#allocation2]  }
 0x11c   :  { %v1579_v4 = vadd.f32 %v2826_v11, %v1509_v1  ;;  %s2693_s23 = sshll.u32 %s3907_s6, 4  ;;  %s2694_s23 = int_to_ptr.vmem [resolvable:$true] %s2693_s23 }
 0x11d   :  { %s3855_s24 = scalar_lea.vmem %s2694_s23, 32  ;;  %p3860_p1 = scmp.lt.s32.totalorder %s2694_s23, %s2694_s23 }
 0x11e   :  { %v1649_v5 = vadd.f32 %v2861_v12, %v1579_v4  ;;  %p3856_p0 = scmp.ne.s32.totalorder %s2694_s23, %s3855_s24  ;;  %p3861_p2 = scmp.lt.s32.totalorder %s3855_s24, %s3855_s24 }
 0x120   :  { %p3862_p3 = por %p3861_p2, %p3860_p1 }
 0x122   :  { %p3863_p4 = pnand %p3862_p3, %p3856_p0 }
 0x138   :  { %v2894_v13 = vpop.f32.mrb[4].mxu0 }
 0x139   :  { %v2929_v14 = vpop.f32.mrb[4].mxu1  ;;  %v2895_v15 = vpop.f32.mrb[5].mxu0 }
 0x13a   :  { %v2930_v16 = vpop.f32.mrb[5].mxu1  ;;  %v2896_v17 = vadd.f32 %v2895_v15, %v2894_v13  ;;  %v2715_v13 = vld [vmem:[%s4534_s3] ss:$0 sm:$0xff] }
 0x13b   :  { %v2931_v18 = vadd.f32 %v2930_v16, %v2929_v14  ;;  %v2716_v16 = vld [vmem:[%s4535_s4] ss:$0 sm:$0xff] }
 0x13c   :  { %v1719_v19 = vadd.f32 %v2896_v17, %v1649_v5 }
 0x13e   :  { %v1789_v20 = vadd.f32 %v2931_v18, %v1719_v19 }
 0x158   :  { %v2964_v23 = vpop.f32.mrb[6].mxu0 }
 0x159   :  { %v2999_v30 = vpop.f32.mrb[6].mxu1  ;;  %v2965_v34 = vpop.f32.mrb[7].mxu0 }
 0x15a   :  { %v3000_v35 = vpop.f32.mrb[7].mxu1  ;;  %v2966_v36 = vadd.f32 %v2965_v34, %v2964_v23 }
 0x15b   :  { %v3001_v38 = vadd.f32 %v3000_v35, %v2999_v30 }
 0x15c   :  { %v1859_v31 = vadd.f32 %v2966_v36, %v1789_v20 }
 0x15e   :  { %v1929_v43 = vadd.f32 %v3001_v38, %v1859_v31 }
 0x178   :  { %v3034_v44 = vpop.f32.mrb[8].mxu0 }
 0x179   :  { %v3069_v45 = vpop.f32.mrb[8].mxu1  ;;  %v3035_v46 = vpop.f32.mrb[9].mxu0 }
 0x17a   :  { %v3070_v47 = vpop.f32.mrb[9].mxu1  ;;  %v3036_v48 = vadd.f32 %v3035_v46, %v3034_v44 }
 0x17b   :  { %v3071_v49 = vadd.f32 %v3070_v47, %v3069_v45 }
 0x17c   :  { %v1999_v41 = vadd.f32 %v3036_v48, %v1929_v43 }
 0x17e   :  { %v2069_v42 = vadd.f32 %v3071_v49, %v1999_v41 }
 0x198   :  { %v3104_v52 = vpop.f32.mrb[10].mxu0 }
 0x199   :  { %v3139_v53 = vpop.f32.mrb[10].mxu1  ;;  %v3105_v54 = vpop.f32.mrb[11].mxu0 }
 0x19a   :  { %v3140_v55 = vpop.f32.mrb[11].mxu1  ;;  %v3106_v56 = vadd.f32 %v3105_v54, %v3104_v52 }
 0x19b   :  { %v3141_v57 = vadd.f32 %v3140_v55, %v3139_v53 }
 0x19c   :  { %v2139_v58 = vadd.f32 %v3106_v56, %v2069_v42 }
 0x19e   :  { %v2209_v50 = vadd.f32 %v3141_v57, %v2139_v58 }
 0x1b8   :  { %v3174_v51 = vpop.f32.mrb[12].mxu0 }
 0x1b9   :  { %v3209_v61 = vpop.f32.mrb[12].mxu1  ;;  %v3175_v62 = vpop.f32.mrb[13].mxu0 }
 0x1ba   :  { %v3210_v63 = vpop.f32.mrb[13].mxu1  ;;  %v3176_v0 = vadd.f32 %v3175_v62, %v3174_v51 }
 0x1bb   :  { %v3211_v1 = vadd.f32 %v3210_v63, %v3209_v61 }
 0x1bc   :  { %v2279_v2 = vadd.f32 %v3176_v0, %v2209_v50 }
 0x1be   :  { %v2349_v3 = vadd.f32 %v3211_v1, %v2279_v2 }
 0x1d8   :  { %v3244_v59 = vpop.f32.mrb[14].mxu0 }
 0x1d9   :  { %v3279_v60 = vpop.f32.mrb[14].mxu1  ;;  %v3245_v6 = vpop.f32.mrb[15].mxu0 }
 0x1da   :  { %v3280_v7 = vpop.f32.mrb[15].mxu1  ;;  %v3246_v8 = vadd.f32 %v3245_v6, %v3244_v59 }
 0x1db   :  { %v3281_v9 = vadd.f32 %v3280_v7, %v3279_v60 }
 0x1dc   :  { %v2419_v11 = vadd.f32 %v3246_v8, %v2349_v3  ;;  %v2592_v12 = vpop.f32.mrb[16].mxu0 }
 0x1dd   :  { %v2593_v4 = vadd.f32 %v2717_v10, %v2592_v12  ;;  %v3297_v5 = vpop.f32.mrb[17].mxu0 }
 0x1de   :  { %v2489_v14 = vadd.f32 %v3281_v9, %v2419_v11 }
 0x1df   :  { %v2596_v15 = vmax.f32 %v2593_v4, 0.0 }
 0x1e0   :  { %v2499_v17 = vmul.f32 %v2715_v13, %v2489_v14 }
 0x1e1   :  { %3315 = vmatmul.mubr.msk.f32.vlgmr.msra.gmra.mrb[16].mxu1 %vm2612_vm3, %v2596_v15 }
 0x1e2   :  { %v2507_v18 = vadd.f32 %v2716_v16, %v2499_v17 }
 0x1e4   :  { %2508 = vst [vmem:[#allocation2] sm:$0x3] %v2507_v18 }
 0x1e5   :  { %3866 = shalt.err (!%p3863_p4)
}
 0x1e6   :  { %s3867_s1 = scalar_lea.hbm %s4540_s9, 32 }
 0x1e7   :  { %p3868_p5 = scmp.ne.s32.totalorder %s4540_s9, %s3867_s1  ;;  %p3871_p6 = scmp.lt.u32.totalorder %s3867_s1, %s4540_s9 }
 0x1e9   :  { %p3873_p7 = pnand %p3871_p6, %p3868_p5 }
 0x1eb   :  { %3876 = shalt.err (!%p3873_p7)
}
 0x1ec   :  { %2696 = dma.vmem_to_hbm [thread:$0]  %s2694_s23, 32, %s4540_s9, [#allocation3]   ;;  %v2720_v19 = vld [vmem:[%s4539_s8] ss:$0 sm:$0xff] }
 0x1ed   :  { %s3908_s12 = smov [#allocation4]  }
 0x1ee   :  { %s2703_s13 = sshll.u32 %s3908_s12, 4  ;;  %s2704_s13 = int_to_ptr.vmem [resolvable:$true] %s2703_s13 }
 0x1ef   :  { %s3877_s14 = scalar_lea.vmem %s2704_s13, 32  ;;  %p3882_p9 = scmp.lt.s32.totalorder %s2704_s13, %s2704_s13 }
 0x1f0   :  { %p3878_p8 = scmp.ne.s32.totalorder %s2704_s13, %s3877_s14  ;;  %p3883_p10 = scmp.lt.s32.totalorder %s3877_s14, %s3877_s14 }
 0x1f2   :  { %p3884_p11 = por %p3883_p10, %p3882_p9 }
 0x1f4   :  { %p3885_p12 = pnand %p3884_p11, %p3878_p8 }
 0x2b4   :  { %v2682_v20 = vpop.f32.mrb[16].mxu1 }
 0x2b5   :  { %v2683_v37 = vadd.f32 %v2720_v19, %v2682_v20  ;;  %v3316_v21 = vpop.f32.mrb[17].mxu1 }
 0x2b7   :  { %2686 = vst [vmem:[#allocation4] sm:$0x3] %v2683_v37 }
 0x2b8   :  { %3888 = shalt.err (!%p3885_p12)
}
 0x2b9   :  { %s3889_s16 = scalar_lea.hbm %s4541_s10, 32 }
 0x2ba   :  { %p3890_p13 = scmp.ne.s32.totalorder %s4541_s10, %s3889_s16  ;;  %p3893_p0 = scmp.lt.u32.totalorder %s3889_s16, %s4541_s10 }
 0x2bc   :  { %p3895_p1 = pnand %p3893_p0, %p3890_p13 }
 0x2be   :  { %3898 = shalt.err (!%p3895_p1)
}
 0x2bf   :  { %2706 = dma.vmem_to_hbm [thread:$0]  %s2704_s13, 32, %s4541_s10, [#allocation5]  }
 0x2c0   :  { %3899 = dma.done.wait [#allocation3], 32  }
 0x2c1   :  { %3900 = vsyncadd [#allocation3], 4294967264 }
 0x2c2   :  { %3901 = dma.done.wait [#allocation5], 32  }
 0x2c3   :  { %3902 = vsyncadd [#allocation5], 4294967264 }
 0x2c4   :  { %2713 = vsyncpa [#allocation3], 1 }
 0x2c5   :  { %2714 = vsyncpa [#allocation5], 1 }

</bundles_post_ra>
